<compile_context>
chip_gen: v6e
topology: v6e:2x2x1
jax: 0.10.0
libtpu: 0.0.40
codegen_flags: <defaults>
</compile_context>

<pallas_src>
import jax
import jax.numpy as jnp
from jax.experimental import pallas as pl
from jax.experimental.pallas import tpu as pltpu


# Below this total byte count, jnp.pad beats the pallas_call dispatch overhead.
_PALLAS_MIN_BYTES = 1 << 20  # 1 MiB

# Keep double-buffered (input tile + output tile) comfortably under the
# default scoped-VMEM limits on all generations (v5e 16 MiB, v6e/v7x 32 MiB;
# v7x physical VMEM is only 64 MiB).
_VMEM_TILE_BUDGET_BYTES = 16 * 1024 * 1024
_VMEM_LIMIT_BYTES = 32 * 1024 * 1024


def _pad_kernel(x_ref, o_ref):
    """out[:, :L] = x ; out[:, L] = 0   (no redundant full-tile zero store)."""
    L = x_ref.shape[-1]
    o_ref[:, :L] = x_ref[...]
    o_ref[:, L:] = jnp.zeros((o_ref.shape[0], 1), o_ref.dtype)


def _choose_row_tile(rows: int, L: int, itemsize: int) -> int:
    """Pick a row-tile size: big (target 512-1024 rows), multiple of 8, VMEM-safe."""
    # Double buffering holds 2 * (in_tile + out_tile) ~= 2 * TR * (2L+1) * itemsize.
    max_tr_by_vmem = max(8, _VMEM_TILE_BUDGET_BYTES // (2 * (2 * L + 1) * itemsize))
    tr = min(rows, 1024, max_tr_by_vmem)
    if tr >= rows:
        return rows  # single tile; block equals full array dims -> always legal
    return max(8, (tr // 8) * 8)  # sublane-aligned tile


def _pallas_pad_last_dim(x: jax.Array) -> jax.Array:
    """Zero-pad the last dim by one using a tiled, pipelined Pallas copy."""
    L = x.shape[-1]
    lead = x.shape[:-1]
    rows = 1
    for d in lead:
        rows *= d

    x2 = x.reshape(rows, L)
    itemsize = x2.dtype.itemsize
    tr = _choose_row_tile(rows, L, itemsize)
    grid = (pl.cdiv(rows, tr),)

    out2 = pl.pallas_call(
        _pad_kernel,
        out_shape=jax.ShapeDtypeStruct((rows, L + 1), x2.dtype),
        grid=grid,
        in_specs=[pl.BlockSpec((tr, L), lambda i: (i, 0))],
        out_specs=pl.BlockSpec((tr, L + 1), lambda i: (i, 0)),
        compiler_params=pltpu.CompilerParams(
            dimension_semantics=("parallel",),   # shard row tiles across v7x's 2 TCs
            vmem_limit_bytes=_VMEM_LIMIT_BYTES,
        ),
        cost_estimate=pl.CostEstimate(
            flops=0,
            transcendentals=0,
            bytes_accessed=(rows * L + rows * (L + 1)) * itemsize,
        ),
    )(x2)

    return out2.reshape(*lead, L + 1)


def padder(x: jax.Array, *, force_pallas: bool = False) -> jax.Array:
    """JAX/Pallas equivalent of Padder.forward.

    Returns x zero-padded on the right of the last dim by one element if that
    dim is odd, otherwise returns x unchanged.
    """
    L = x.shape[-1]
    if L % 2 == 0:
        # Even length: PyTorch module returns the input unchanged.
        return x

    total_bytes = x.size * x.dtype.itemsize
    if not force_pallas and total_bytes < _PALLAS_MIN_BYTES:
        # Tiny copy: custom-call dispatch overhead exceeds the copy cost, and
        # XLA's pad fuses into the consumer.
        pad_cfg = [(0, 0)] * (x.ndim - 1) + [(0, 1)]
        return jnp.pad(x, pad_cfg)

    return _pallas_pad_last_dim(x)


if __name__ == "__main__":
    key = jax.random.PRNGKey(0)
    k1, k2, k3 = jax.random.split(key, 3)

    # Odd-length, small NCL shape (module-typical): force the Pallas path.
    N, C, L_odd = 2, 4, 15
    x_odd = jax.random.normal(k1, (N, C, L_odd), dtype=jnp.float32)
    y_odd = jax.block_until_ready(padder(x_odd, force_pallas=True))
    ref_odd = jnp.pad(x_odd, ((0, 0), (0, 0), (0, 1)))
    assert y_odd.shape == (N, C, L_odd + 1)
    assert jnp.allclose(y_odd, ref_odd)

    # Odd-length with enough rows (4*300 = 1200 > TR = 1024) to exercise the
    # multi-tile pipelined path including a partial last row-block.
    x_big = jax.random.normal(k2, (4, 300, 127), dtype=jnp.float32)
    y_big = jax.block_until_ready(padder(x_big, force_pallas=True))
    ref_big = jnp.pad(x_big, ((0, 0), (0, 0), (0, 1)))
    assert y_big.shape == (4, 300, 128)
    assert jnp.allclose(y_big, ref_big)

    # Even-length: identity passthrough.
    x_even = jax.random.normal(k3, (N, C, 16), dtype=jnp.float32)
    y_even = jax.block_until_ready(padder(x_even))
    assert y_even.shape == (N, C, 16)
    assert jnp.allclose(y_even, x_even)

    print("KERNEL_OK")
</pallas_src>

<mosaic_0001>
module attributes {stable_mosaic.version = 11 : i64} {
  func.func @_pad_kernel(%arg0: i32, %arg1: memref<8x15xf32, #tpu.memory_space<vmem>>, %arg2: memref<8x16xf32, #tpu.memory_space<vmem>>) attributes {dimension_semantics = [#tpu.dimension_semantics<parallel>], iteration_bounds = array<i64: 1>, scalar_prefetch = 0 : i64, scratch_operands = 0 : i64, tpu.core_type = #tpu.core_type<tc>, window_params = [{transform_indices = @transform_0, window_bounds = array<i64: 8, 15>}, {transform_indices = @transform_1, window_bounds = array<i64: 8, 16>}]} {
    %c0 = arith.constant 0 : index
    %c0_0 = arith.constant 0 : index
    %0 = vector.load %arg1[%c0, %c0_0] : memref<8x15xf32, #tpu.memory_space<vmem>>, vector<8x15xf32>
    %c0_1 = arith.constant 0 : index
    %c0_2 = arith.constant 0 : index
    %1 = vector.load %arg2[%c0_1, %c0_2] : memref<8x16xf32, #tpu.memory_space<vmem>>, vector<8x15xf32>
    tpu.vector_store %arg2[%c0_1, %c0_2], %0 {strides = array<i32>} : memref<8x16xf32, #tpu.memory_space<vmem>>, vector<8x15xf32>,
    %cst = arith.constant 0.000000e+00 : f32
    %2 = vector.broadcast %cst : f32 to vector<8x1xf32>
    %c0_3 = arith.constant 0 : index
    %c15 = arith.constant 15 : index
    %3 = vector.load %arg2[%c0_3, %c15] : memref<8x16xf32, #tpu.memory_space<vmem>>, vector<8x1xf32>
    tpu.vector_store %arg2[%c0_3, %c15], %2 {strides = array<i32>} : memref<8x16xf32, #tpu.memory_space<vmem>>, vector<8x1xf32>,
    return
  }
  func.func @transform_0(%arg0: i32) -> (i32, i32) {
    %c0_i32 = arith.constant 0 : i32
    %c0_i32_0 = arith.constant 0 : i32
    return %arg0, %c0_i32 : i32, i32
  }
  func.func @transform_1(%arg0: i32) -> (i32, i32) {
    %c0_i32 = arith.constant 0 : i32
    %c0_i32_0 = arith.constant 0 : i32
    return %arg0, %c0_i32 : i32, i32
  }
}

</mosaic_0001>

<bundles_post_ra>
// kernel: tpu_custom_call.1
= control target key start
LH: loop header
LB: loop body
LE: loop exit
PB: predicated region body
PF: predicated region fallthrough
CT: control target
= control target key end

     0   :  { %6 = vsyncpa [#allocation3], 0  ;;  %s107_s0 = inlined_call_operand.hbm [shape: f32[8,15], index: 0, kind: input, shape index: {}]   ;;  %s108_s1 = inlined_call_operand.hbm [shape: f32[8,16], index: 1, kind: output, shape index: {}]  }
   0x1   :  { %7 = vsyncpa [#allocation4], 0  ;;  %s88_s6 = smov [#allocation2]  }
   0x2   :  { %s14_s7 = sshll.u32 %s88_s6, 4  ;;  %s15_s7 = int_to_ptr.vmem [resolvable:$true] %s14_s7 }
   0x3   :  { %s52_s8 = scalar_lea.vmem %s15_s7, 128  ;;  %p57_p1 = scmp.lt.s32.totalorder %s15_s7, %s15_s7 }
   0x4   :  { %p53_p0 = scmp.ne.s32.totalorder %s15_s7, %s52_s8  ;;  %p58_p2 = scmp.lt.s32.totalorder %s52_s8, %s52_s8 }
   0x6   :  { %p59_p3 = por %p58_p2, %p57_p1 }
   0x8   :  { %p60_p4 = pnand %p59_p3, %p53_p0 }
   0xa   :  { %63 = shalt.err (!%p60_p4)
}
   0xb   :  { %17 = dma.hbm_to_vmem [thread:$0]  %s107_s0, 128, %s15_s7, [#allocation3]  }
   0xc   :  { %84 = dma.done.wait [#allocation3], 128  }
   0xd   :  { %85 = vsyncadd [#allocation3], 4294967168  ;;  %s89_s11 = smov [#allocation5]   ;;  %vm22_vm0 = vcmask 121856   ;;  %vm24_vm1 = vcmask 130168   ;;  %v21_v0 = vld [vmem:[#allocation2] sm:$0xff] }
   0xe   :  { %s32_s12 = sshll.u32 %s89_s11, 4  ;;  %23 = vst.msk [vmem:[#allocation5] sm:$0xff] %vm22_vm0, %v21_v0  ;;  %v90_v1 = vmov 0.0   ;;  %s33_s12 = int_to_ptr.vmem [resolvable:$true] %s32_s12 }
   0xf   :  { %25 = vst.msk [vmem:[#allocation5] sm:$0xff] %vm24_vm1, %v90_v1  ;;  %s64_s13 = scalar_lea.vmem %s33_s12, 128  ;;  %p69_p6 = scmp.lt.s32.totalorder %s33_s12, %s33_s12 }
  0x10   :  { %p65_p5 = scmp.ne.s32.totalorder %s33_s12, %s64_s13  ;;  %p70_p7 = scmp.lt.s32.totalorder %s64_s13, %s64_s13 }
  0x12   :  { %p71_p8 = por %p70_p7, %p69_p6 }
  0x14   :  { %p72_p9 = pnand %p71_p8, %p65_p5 }
  0x16   :  { %75 = shalt.err (!%p72_p9)
}
  0x17   :  { %35 = dma.vmem_to_hbm [thread:$0]  %s33_s12, 128, %s108_s1, [#allocation4]  }
  0x18   :  { %86 = dma.done.wait [#allocation4], 128  }
  0x19   :  { %87 = vsyncadd [#allocation4], 4294967168 }
  0x1a   :  { %39 = vsyncpa [#allocation3], 1 }
  0x1b   :  { %40 = vsyncpa [#allocation4], 1 }

</bundles_post_ra>
